<compile_context>
chip_gen: v7x
topology: tpu7x:2x2x1
jax: 0.10.0
libtpu: 0.0.40
codegen_flags: <defaults>
</compile_context>

<pallas_src>
import functools

import jax
import jax.numpy as jnp
from jax import lax
from jax.experimental import pallas as pl
from jax.experimental.pallas import tpu as pltpu

# ---------------- hyper-parameters (small, deterministic) -------------------
B = 2            # batch
C_IN = 4         # input channels
H = W = 16       # spatial
C_ENC = 8        # conv channels
LATENT_DIM = 16
HIDDEN_DIM = 32
NUM_CLASSES = 10
CAPACITY = 16    # episodic memory slots
TOP_K = 4
DECAY_RATE = 0.1
LAMBDA_COEF = 0.5  # unused in the y=None forward path

# ---------------- packed parameter/memory slab layout -----------------------
# One lane-padded f32 slab; every section starts on an 8-row (sublane) boundary
# so the in-kernel static ref slices are aligned loads.
LANES = 128
R_CONV_W = 0                    # (9*C_IN, C_ENC)   = (36, 8)
R_ENC_W = 40                    # (C_ENC, d)        = (8, 16)
R_CNT = 48                      # normalized keys^T = (d, N) = (16, 16)
R_ZB = 64                       # z_buffer          = (N, d) = (16, 16)
R_W1Z = 80                      # dec_w1 z-half     = (d, hidden) = (16, 32)
R_W1R = 96                      # dec_w1 r-half     = (d, hidden) = (16, 32)
R_W2 = 112                      # dec_w2            = (hidden, classes) = (32, 10)
R_VEC = 144                     # one (8,128) tile of row vectors:
#   row R_VEC+0: conv_b (C_ENC)      row R_VEC+1: enc_b (d)
#   row R_VEC+2: salience (N)        row R_VEC+3: dec_b1 (hidden)
#   row R_VEC+4: dec_b2 (classes)
R_TOTAL = 152                   # 152*128*4 B ~= 76 KiB -> one DMA


# ------------------------- fused forward kernel ------------------------------
def epinet_kernel(patches_ref, slab_ref, out_ref, *, batch, hw, top_k):
    """patches: (B*H*W, 9*Cin) im2col; slab: (R_TOTAL, 128) packed params/memory;
    out: (B, classes)."""
    # ---- unpack the single packed slab with static (compile-time) ref slices
    cw = slab_ref[R_CONV_W:R_CONV_W + 9 * C_IN, 0:C_ENC]          # (36, 8)
    ew = slab_ref[R_ENC_W:R_ENC_W + C_ENC, 0:LATENT_DIM]          # (8, 16)
    cnt = slab_ref[R_CNT:R_CNT + LATENT_DIM, 0:CAPACITY]          # (16, 16) keys^T (pre-normalized)
    zb = slab_ref[R_ZB:R_ZB + CAPACITY, 0:LATENT_DIM]             # (16, 16)
    w1z = slab_ref[R_W1Z:R_W1Z + LATENT_DIM, 0:HIDDEN_DIM]        # (16, 32)
    w1r = slab_ref[R_W1R:R_W1R + LATENT_DIM, 0:HIDDEN_DIM]        # (16, 32)
    w2 = slab_ref[R_W2:R_W2 + HIDDEN_DIM, 0:NUM_CLASSES]          # (32, 10)
    vec = slab_ref[R_VEC:R_VEC + 8, :]                            # (8, 128) bias/salience tile
    cb = vec[0:1, 0:C_ENC]                                        # (1, 8)
    eb = vec[1:2, 0:LATENT_DIM]                                   # (1, 16)
    sal = vec[2:3, 0:CAPACITY]                                    # (1, 16) precomputed salience
    b1 = vec[3:4, 0:HIDDEN_DIM]                                   # (1, 32)
    b2 = vec[4:5, 0:NUM_CLASSES]                                  # (1, 10)

    # ---- Encoder: 3x3 conv (pad=1) as ONE im2col MXU matmul (K = 9*Cin) + ReLU
    act = jnp.maximum(
        jnp.dot(patches_ref[...], cw, preferred_element_type=jnp.float32) + cb,
        0.0)                                                       # (B*H*W, Cenc)

    # Global average pool as an MXU matmul: block-diagonal (B, B*H*W) selector
    # with 1/HW entries, built from iota (keeps the reduction off the XLU and
    # avoids any reshape/relayout of the activation tile).
    col = lax.broadcasted_iota(jnp.int32, (batch, batch * hw), 1)
    row = lax.broadcasted_iota(jnp.int32, (batch, batch * hw), 0)
    in_block = (col >= row * hw) & (col < (row + 1) * hw)
    pool = jnp.where(in_block, jnp.float32(1.0 / hw), jnp.float32(0.0))
    pooled = jnp.dot(pool, act, preferred_element_type=jnp.float32)   # (B, Cenc)
    z = jnp.dot(pooled, ew, preferred_element_type=jnp.float32) + eb  # (B, d)

    # ---- RecallEngine: salience-weighted cosine against pre-normalized,
    #      pre-transposed keys (plain NN-layout matmul, no relayout).
    zn = z * lax.rsqrt(jnp.sum(z * z, axis=-1, keepdims=True) + 1e-8)
    scores = jnp.dot(zn, cnt, preferred_element_type=jnp.float32) * sal  # (B, N)

    # Top-k: knock out the running max `top_k` times; the selected slots are
    # exactly the entries overwritten with -1e30 (no separate mask accumulator).
    # NOTE: exact ties select all tied slots in one step (torch.topk picks
    # exactly k with deterministic tie-breaking) -- irrelevant for continuous
    # float scores.
    neg_big = jnp.float32(-1e30)
    work = scores
    for _ in range(top_k):
        m = jnp.max(work, axis=1, keepdims=True)
        work = jnp.where(work == m, neg_big, work)
    masked = jnp.where(work < jnp.float32(-1e29), scores, neg_big)

    # Softmax over the selected scores only, then one (B,N)x(N,d) gather matmul.
    mx = jnp.max(masked, axis=1, keepdims=True)
    e = jnp.exp(masked - mx)                       # non-selected underflow to 0
    probs = e / jnp.sum(e, axis=1, keepdims=True)                    # (B, N)
    r = jnp.dot(probs, zb, preferred_element_type=jnp.float32)       # (B, d)

    # ---- Decoder MLP with pre-split first-layer weight (no lane-axis concat).
    hid = jnp.maximum(
        jnp.dot(z, w1z, preferred_element_type=jnp.float32)
        + jnp.dot(r, w1r, preferred_element_type=jnp.float32) + b1, 0.0)
    out_ref[...] = jnp.dot(hid, w2, preferred_element_type=jnp.float32) + b2


# ------------------------------ wrapper --------------------------------------
@jax.jit
def epinet_forward(x_nchw, slab):
    batch = x_nchw.shape[0]
    # NCHW -> NHWC, pad by 1, build the im2col patch matrix.  Under jit this
    # collapses into one XLA fusion, and allow_input_fusion lets XLA fuse that
    # producer into the pallas call's input (no dedicated HBM round trip).
    x = jnp.transpose(x_nchw, (0, 2, 3, 1)).astype(jnp.float32)        # (B,H,W,Cin)
    xp = jnp.pad(x, ((0, 0), (1, 1), (1, 1), (0, 0)))                  # (B,H+2,W+2,Cin)
    patches = jnp.concatenate(
        [xp[:, dy:dy + H, dx:dx + W, :] for dy in range(3) for dx in range(3)],
        axis=-1).reshape(batch * H * W, 9 * C_IN)                      # (B*H*W, 36)

    kern = functools.partial(epinet_kernel, batch=batch, hw=H * W, top_k=TOP_K)
    vmem = pl.BlockSpec(memory_space=pltpu.MemorySpace.VMEM)
    return pl.pallas_call(
        kern,
        out_shape=jax.ShapeDtypeStruct((batch, NUM_CLASSES), jnp.float32),
        in_specs=[vmem, vmem],
        out_specs=vmem,
        compiler_params=pltpu.CompilerParams(
            allow_input_fusion=[True, False]),   # fuse the patches producer
    )(patches, slab)


# -------------------------- deterministic init -------------------------------
def init_raw_params(key):
    ks = jax.random.split(key, 12)
    return {
        # conv_w kept in HWIO so .reshape(9*Cin, Cenc) matches the patch concat
        # order (dy, dx, ci).  Real PyTorch OIHW weights would need a permute
        # to HWIO before this reshape.
        "conv_w": 0.1 * jax.random.normal(ks[0], (3, 3, C_IN, C_ENC), jnp.float32),
        "conv_b": 0.1 * jax.random.normal(ks[1], (C_ENC,), jnp.float32),
        "enc_w": 0.1 * jax.random.normal(ks[2], (C_ENC, LATENT_DIM), jnp.float32),
        "enc_b": 0.1 * jax.random.normal(ks[3], (LATENT_DIM,), jnp.float32),
        "dec_w1": 0.1 * jax.random.normal(ks[4], (2 * LATENT_DIM, HIDDEN_DIM), jnp.float32),
        "dec_b1": 0.1 * jax.random.normal(ks[5], (HIDDEN_DIM,), jnp.float32),
        "dec_w2": 0.1 * jax.random.normal(ks[6], (HIDDEN_DIM, NUM_CLASSES), jnp.float32),
        "dec_b2": 0.1 * jax.random.normal(ks[7], (NUM_CLASSES,), jnp.float32),
        "z_buf": jax.random.normal(ks[8], (CAPACITY, LATENT_DIM), jnp.float32),
        "c_buf": jax.random.normal(ks[9], (CAPACITY, LATENT_DIM), jnp.float32),
        "r0": jnp.abs(jax.random.normal(ks[10], (CAPACITY,), jnp.float32)) + 0.5,
        "tau": jnp.abs(jax.random.normal(ks[11], (CAPACITY,), jnp.float32)),
    }


def pack_slab(p):
    """Pack params + memory into one lane-padded slab.  Recall-side constants
    (salience, normalized+transposed keys) are precomputed here; re-run this
    only when the episodic memory is mutated."""
    sal = p["r0"] * jnp.exp(-DECAY_RATE * p["tau"])                       # (N,)
    cn = p["c_buf"] * lax.rsqrt(
        jnp.sum(p["c_buf"] * p["c_buf"], axis=-1, keepdims=True) + 1e-8)  # (N, d)
    slab = jnp.zeros((R_TOTAL, LANES), jnp.float32)

    def put(s, r, m):
        return s.at[r:r + m.shape[0], :m.shape[1]].set(m)

    slab = put(slab, R_CONV_W, p["conv_w"].reshape(9 * C_IN, C_ENC))
    slab = put(slab, R_ENC_W, p["enc_w"])
    slab = put(slab, R_CNT, cn.T)                        # keys transposed (d, N)
    slab = put(slab, R_ZB, p["z_buf"])
    slab = put(slab, R_W1Z, p["dec_w1"][:LATENT_DIM])
    slab = put(slab, R_W1R, p["dec_w1"][LATENT_DIM:])
    slab = put(slab, R_W2, p["dec_w2"])
    slab = put(slab, R_VEC + 0, p["conv_b"][None, :])
    slab = put(slab, R_VEC + 1, p["enc_b"][None, :])
    slab = put(slab, R_VEC + 2, sal[None, :])
    slab = put(slab, R_VEC + 3, p["dec_b1"][None, :])
    slab = put(slab, R_VEC + 4, p["dec_b2"][None, :])
    return slab


# --------------------- pure-JAX reference (correctness) ----------------------
def epinet_reference(x_nchw, p):
    x = jnp.transpose(x_nchw, (0, 2, 3, 1)).astype(jnp.float32)
    xp = jnp.pad(x, ((0, 0), (1, 1), (1, 1), (0, 0)))
    patches = jnp.concatenate(
        [xp[:, dy:dy + H, dx:dx + W, :] for dy in range(3) for dx in range(3)],
        axis=-1).reshape(-1, 9 * C_IN)
    conv = patches @ p["conv_w"].reshape(9 * C_IN, C_ENC) + p["conv_b"]
    act = jnp.maximum(conv, 0.0).reshape(x.shape[0], H * W, C_ENC)
    pooled = jnp.mean(act, axis=1)
    z = pooled @ p["enc_w"] + p["enc_b"]

    sal = p["r0"] * jnp.exp(-DECAY_RATE * p["tau"])
    zn = z / jnp.sqrt(jnp.sum(z * z, axis=-1, keepdims=True) + 1e-8)
    cn = p["c_buf"] / jnp.sqrt(jnp.sum(p["c_buf"] ** 2, axis=-1, keepdims=True) + 1e-8)
    scores = (zn @ cn.T) * sal[None, :]
    vals, idx = lax.top_k(scores, TOP_K)
    probs = jax.nn.softmax(vals, axis=-1)
    r = jnp.einsum("bk,bkd->bd", probs, p["z_buf"][idx])

    hid = jnp.maximum(jnp.concatenate([z, r], axis=-1) @ p["dec_w1"] + p["dec_b1"], 0.0)
    return hid @ p["dec_w2"] + p["dec_b2"]


if __name__ == "__main__":
    key = jax.random.PRNGKey(0)
    kx, kp = jax.random.split(key)
    x = jax.random.normal(kx, (B, C_IN, H, W), jnp.float32)   # NCHW like PyTorch
    raw = init_raw_params(kp)
    slab = pack_slab(raw)

    logits = epinet_forward(x, slab)
    jax.block_until_ready(logits)

    ref = epinet_reference(x, raw)
    assert logits.shape == (B, NUM_CLASSES)
    assert bool(jnp.all(jnp.isfinite(logits)))
    # Loose tolerance: MXU f32 matmul precision inside the kernel may differ
    # slightly from XLA's default dot precision in the reference.
    assert bool(jnp.allclose(logits, ref, rtol=3e-2, atol=3e-2)), "mismatch vs reference"
    print("KERNEL_OK")
</pallas_src>

<mosaic_0001>
module attributes {stable_mosaic.version = 11 : i64} {
  func.func @epinet_kernel(%arg0: memref<512x36xf32, #tpu.memory_space<vmem>>, %arg1: memref<152x128xf32, #tpu.memory_space<vmem>>, %arg2: memref<2x10xf32, #tpu.memory_space<vmem>>) attributes {dimension_semantics = [], scalar_prefetch = 0 : i64, scratch_operands = 0 : i64, tpu.core_type = #tpu.core_type<tc>} {
    %c0 = arith.constant 0 : index
    %c0_0 = arith.constant 0 : index
    %0 = vector.load %arg1[%c0, %c0_0] : memref<152x128xf32, #tpu.memory_space<vmem>>, vector<36x8xf32>
    %c40 = arith.constant 40 : index
    %c0_1 = arith.constant 0 : index
    %1 = vector.load %arg1[%c40, %c0_1] : memref<152x128xf32, #tpu.memory_space<vmem>>, vector<8x16xf32>
    %c48 = arith.constant 48 : index
    %c0_2 = arith.constant 0 : index
    %2 = vector.load %arg1[%c48, %c0_2] : memref<152x128xf32, #tpu.memory_space<vmem>>, vector<16x16xf32>
    %c64 = arith.constant 64 : index
    %c0_3 = arith.constant 0 : index
    %3 = vector.load %arg1[%c64, %c0_3] : memref<152x128xf32, #tpu.memory_space<vmem>>, vector<16x16xf32>
    %c80 = arith.constant 80 : index
    %c0_4 = arith.constant 0 : index
    %4 = vector.load %arg1[%c80, %c0_4] : memref<152x128xf32, #tpu.memory_space<vmem>>, vector<16x32xf32>
    %c96 = arith.constant 96 : index
    %c0_5 = arith.constant 0 : index
    %5 = vector.load %arg1[%c96, %c0_5] : memref<152x128xf32, #tpu.memory_space<vmem>>, vector<16x32xf32>
    %c112 = arith.constant 112 : index
    %c0_6 = arith.constant 0 : index
    %6 = vector.load %arg1[%c112, %c0_6] : memref<152x128xf32, #tpu.memory_space<vmem>>, vector<32x10xf32>
    %c144 = arith.constant 144 : index
    %c0_7 = arith.constant 0 : index
    %7 = vector.load %arg1[%c144, %c0_7] : memref<152x128xf32, #tpu.memory_space<vmem>>, vector<8x128xf32>
    %8 = vector.extract_strided_slice %7 {offsets = [0, 0], sizes = [1, 8], strides = [1, 1]} : vector<8x128xf32> to vector<1x8xf32>
    %9 = vector.extract_strided_slice %7 {offsets = [1, 0], sizes = [1, 16], strides = [1, 1]} : vector<8x128xf32> to vector<1x16xf32>
    %10 = vector.extract_strided_slice %7 {offsets = [2, 0], sizes = [1, 16], strides = [1, 1]} : vector<8x128xf32> to vector<1x16xf32>
    %11 = vector.extract_strided_slice %7 {offsets = [3, 0], sizes = [1, 32], strides = [1, 1]} : vector<8x128xf32> to vector<1x32xf32>
    %12 = vector.extract_strided_slice %7 {offsets = [4, 0], sizes = [1, 10], strides = [1, 1]} : vector<8x128xf32> to vector<1x10xf32>
    %c0_8 = arith.constant 0 : index
    %c0_9 = arith.constant 0 : index
    %13 = vector.load %arg0[%c0_8, %c0_9] : memref<512x36xf32, #tpu.memory_space<vmem>>, vector<512x36xf32>
    %cst = arith.constant dense<0.000000e+00> : vector<512x8xf32>
    %14 = tpu.matmul %13, %0, %cst {dimension_numbers = #tpu.dot_dimension_numbers<[1], [0], [0], [1], [0, 0, 1, 1], [], []>} : vector<512x36xf32>, vector<36x8xf32>, vector<512x8xf32> -> vector<512x8xf32>
    %15 = vector.broadcast %8 : vector<1x8xf32> to vector<512x8xf32>
    %16 = arith.addf %14, %15 : vector<512x8xf32>
    %cst_10 = arith.constant 0.000000e+00 : f32
    %17 = vector.broadcast %cst_10 : f32 to vector<512x8xf32>
    %18 = arith.maximumf %16, %17 : vector<512x8xf32>
    %19 = tpu.iota {dimensions = array<i32: 1>} : vector<2x512xi32>
    %20 = tpu.iota {dimensions = array<i32: 0>} : vector<2x512xi32>
    %c256_i32 = arith.constant 256 : i32
    %21 = vector.broadcast %c256_i32 : i32 to vector<2x512xi32>
    %22 = arith.muli %20, %21 : vector<2x512xi32>
    %23 = arith.cmpi sge, %19, %22 : vector<2x512xi32>
    %c1_i32 = arith.constant 1 : i32
    %24 = vector.broadcast %c1_i32 : i32 to vector<2x512xi32>
    %25 = arith.addi %20, %24 : vector<2x512xi32>
    %c256_i32_11 = arith.constant 256 : i32
    %26 = vector.broadcast %c256_i32_11 : i32 to vector<2x512xi32>
    %27 = arith.muli %25, %26 : vector<2x512xi32>
    %28 = arith.cmpi slt, %19, %27 : vector<2x512xi32>
    %29 = arith.andi %23, %28 : vector<2x512xi1>
    %cst_12 = arith.constant 3.906250e-03 : f32
    %cst_13 = arith.constant 0.000000e+00 : f32
    %30 = vector.broadcast %cst_12 : f32 to vector<2x512xf32>
    %31 = vector.broadcast %cst_13 : f32 to vector<2x512xf32>
    %32 = arith.select %29, %30, %31 : vector<2x512xi1>, vector<2x512xf32>
    %cst_14 = arith.constant dense<0.000000e+00> : vector<2x8xf32>
    %33 = tpu.matmul %32, %18, %cst_14 {dimension_numbers = #tpu.dot_dimension_numbers<[1], [0], [0], [1], [0, 0, 1, 1], [], []>} : vector<2x512xf32>, vector<512x8xf32>, vector<2x8xf32> -> vector<2x8xf32>
    %cst_15 = arith.constant dense<0.000000e+00> : vector<2x16xf32>
    %34 = tpu.matmul %33, %1, %cst_15 {dimension_numbers = #tpu.dot_dimension_numbers<[1], [0], [0], [1], [0, 0, 1, 1], [], []>} : vector<2x8xf32>, vector<8x16xf32>, vector<2x16xf32> -> vector<2x16xf32>
    %35 = vector.broadcast %9 : vector<1x16xf32> to vector<2x16xf32>
    %36 = arith.addf %34, %35 : vector<2x16xf32>
    %37 = arith.mulf %36, %36 : vector<2x16xf32>
    %cst_16 = arith.constant dense<0.000000e+00> : vector<2xf32>
    %38 = vector.multi_reduction <add>, %37, %cst_16 [1] : vector<2x16xf32> to vector<2xf32>
    %39 = vector.shape_cast %38 : vector<2xf32> to vector<2x1xf32>
    %cst_17 = arith.constant 9.99999993E-9 : f32
    %40 = vector.broadcast %cst_17 : f32 to vector<2x1xf32>
    %41 = arith.addf %39, %40 : vector<2x1xf32>
    %42 = math.rsqrt %41 : vector<2x1xf32>
    %43 = vector.broadcast %42 : vector<2x1xf32> to vector<2x16xf32>
    %44 = arith.mulf %36, %43 : vector<2x16xf32>
    %cst_18 = arith.constant dense<0.000000e+00> : vector<2x16xf32>
    %45 = tpu.matmul %44, %2, %cst_18 {dimension_numbers = #tpu.dot_dimension_numbers<[1], [0], [0], [1], [0, 0, 1, 1], [], []>} : vector<2x16xf32>, vector<16x16xf32>, vector<2x16xf32> -> vector<2x16xf32>
    %46 = vector.broadcast %10 : vector<1x16xf32> to vector<2x16xf32>
    %47 = arith.mulf %45, %46 : vector<2x16xf32>
    %cst_19 = arith.constant dense<0xFF800000> : vector<2xf32>
    %48 = vector.multi_reduction <maximumf>, %47, %cst_19 [1] : vector<2x16xf32> to vector<2xf32>
    %49 = vector.shape_cast %48 : vector<2xf32> to vector<2x1xf32>
    %50 = vector.broadcast %49 : vector<2x1xf32> to vector<2x16xf32>
    %51 = arith.cmpf oeq, %47, %50 : vector<2x16xf32>
    %cst_20 = arith.constant -1.000000e+30 : f32
    %52 = vector.broadcast %cst_20 : f32 to vector<2x16xf32>
    %53 = arith.select %51, %52, %47 : vector<2x16xi1>, vector<2x16xf32>
    %cst_21 = arith.constant dense<0xFF800000> : vector<2xf32>
    %54 = vector.multi_reduction <maximumf>, %53, %cst_21 [1] : vector<2x16xf32> to vector<2xf32>
    %55 = vector.shape_cast %54 : vector<2xf32> to vector<2x1xf32>
    %56 = vector.broadcast %55 : vector<2x1xf32> to vector<2x16xf32>
    %57 = arith.cmpf oeq, %53, %56 : vector<2x16xf32>
    %cst_22 = arith.constant -1.000000e+30 : f32
    %58 = vector.broadcast %cst_22 : f32 to vector<2x16xf32>
    %59 = arith.select %57, %58, %53 : vector<2x16xi1>, vector<2x16xf32>
    %cst_23 = arith.constant dense<0xFF800000> : vector<2xf32>
    %60 = vector.multi_reduction <maximumf>, %59, %cst_23 [1] : vector<2x16xf32> to vector<2xf32>
    %61 = vector.shape_cast %60 : vector<2xf32> to vector<2x1xf32>
    %62 = vector.broadcast %61 : vector<2x1xf32> to vector<2x16xf32>
    %63 = arith.cmpf oeq, %59, %62 : vector<2x16xf32>
    %cst_24 = arith.constant -1.000000e+30 : f32
    %64 = vector.broadcast %cst_24 : f32 to vector<2x16xf32>
    %65 = arith.select %63, %64, %59 : vector<2x16xi1>, vector<2x16xf32>
    %cst_25 = arith.constant dense<0xFF800000> : vector<2xf32>
    %66 = vector.multi_reduction <maximumf>, %65, %cst_25 [1] : vector<2x16xf32> to vector<2xf32>
    %67 = vector.shape_cast %66 : vector<2xf32> to vector<2x1xf32>
    %68 = vector.broadcast %67 : vector<2x1xf32> to vector<2x16xf32>
    %69 = arith.cmpf oeq, %65, %68 : vector<2x16xf32>
    %cst_26 = arith.constant -1.000000e+30 : f32
    %70 = vector.broadcast %cst_26 : f32 to vector<2x16xf32>
    %71 = arith.select %69, %70, %65 : vector<2x16xi1>, vector<2x16xf32>
    %cst_27 = arith.constant -1.000000e+29 : f32
    %72 = vector.broadcast %cst_27 : f32 to vector<2x16xf32>
    %73 = arith.cmpf olt, %71, %72 : vector<2x16xf32>
    %cst_28 = arith.constant -1.000000e+30 : f32
    %74 = vector.broadcast %cst_28 : f32 to vector<2x16xf32>
    %75 = arith.select %73, %47, %74 : vector<2x16xi1>, vector<2x16xf32>
    %cst_29 = arith.constant dense<0xFF800000> : vector<2xf32>
    %76 = vector.multi_reduction <maximumf>, %75, %cst_29 [1] : vector<2x16xf32> to vector<2xf32>
    %77 = vector.shape_cast %76 : vector<2xf32> to vector<2x1xf32>
    %78 = vector.broadcast %77 : vector<2x1xf32> to vector<2x16xf32>
    %79 = arith.subf %75, %78 : vector<2x16xf32>
    %80 = math.exp %79 : vector<2x16xf32>
    %cst_30 = arith.constant dense<0.000000e+00> : vector<2xf32>
    %81 = vector.multi_reduction <add>, %80, %cst_30 [1] : vector<2x16xf32> to vector<2xf32>
    %82 = vector.shape_cast %81 : vector<2xf32> to vector<2x1xf32>
    %83 = vector.broadcast %82 : vector<2x1xf32> to vector<2x16xf32>
    %84 = arith.divf %80, %83 : vector<2x16xf32>
    %cst_31 = arith.constant dense<0.000000e+00> : vector<2x16xf32>
    %85 = tpu.matmul %84, %3, %cst_31 {dimension_numbers = #tpu.dot_dimension_numbers<[1], [0], [0], [1], [0, 0, 1, 1], [], []>} : vector<2x16xf32>, vector<16x16xf32>, vector<2x16xf32> -> vector<2x16xf32>
    %cst_32 = arith.constant dense<0.000000e+00> : vector<2x32xf32>
    %86 = tpu.matmul %36, %4, %cst_32 {dimension_numbers = #tpu.dot_dimension_numbers<[1], [0], [0], [1], [0, 0, 1, 1], [], []>} : vector<2x16xf32>, vector<16x32xf32>, vector<2x32xf32> -> vector<2x32xf32>
    %cst_33 = arith.constant dense<0.000000e+00> : vector<2x32xf32>
    %87 = tpu.matmul %85, %5, %cst_33 {dimension_numbers = #tpu.dot_dimension_numbers<[1], [0], [0], [1], [0, 0, 1, 1], [], []>} : vector<2x16xf32>, vector<16x32xf32>, vector<2x32xf32> -> vector<2x32xf32>
    %88 = arith.addf %86, %87 : vector<2x32xf32>
    %89 = vector.broadcast %11 : vector<1x32xf32> to vector<2x32xf32>
    %90 = arith.addf %88, %89 : vector<2x32xf32>
    %cst_34 = arith.constant 0.000000e+00 : f32
    %91 = vector.broadcast %cst_34 : f32 to vector<2x32xf32>
    %92 = arith.maximumf %90, %91 : vector<2x32xf32>
    %cst_35 = arith.constant dense<0.000000e+00> : vector<2x10xf32>
    %93 = tpu.matmul %92, %6, %cst_35 {dimension_numbers = #tpu.dot_dimension_numbers<[1], [0], [0], [1], [0, 0, 1, 1], [], []>} : vector<2x32xf32>, vector<32x10xf32>, vector<2x10xf32> -> vector<2x10xf32>
    %94 = vector.broadcast %12 : vector<1x10xf32> to vector<2x10xf32>
    %95 = arith.addf %93, %94 : vector<2x10xf32>
    %c0_36 = arith.constant 0 : index
    %c0_37 = arith.constant 0 : index
    %96 = vector.load %arg2[%c0_36, %c0_37] : memref<2x10xf32, #tpu.memory_space<vmem>>, vector<2x10xf32>
    tpu.vector_store %arg2[%c0_36, %c0_37], %95 {strides = array<i32>} : memref<2x10xf32, #tpu.memory_space<vmem>>, vector<2x10xf32>,
    return
  }
}

</mosaic_0001>

<bundles_post_ra>
// kernel: epinet_forward.1
= control target key start
LH: loop header
LB: loop body
LE: loop exit
PB: predicated region body
PF: predicated region fallthrough
CT: control target
= control target key end

     0   :  { %vm99_vm0 = vcmask 293888   ;;  %vm292_vm1 = vcmask 1043456   ;;  %s2475_s0 = inlined_call_operand.vmem [shape: f32[512,36], index: 0, kind: input, shape index: {}]   ;;  %s2476_s1 = inlined_call_operand.vmem [shape: f32[152,128], index: 1, kind: input, shape index: {}]   ;;  %s2477_s2 = inlined_call_operand.hbm [shape: f32[2,10], index: 2, kind: output, shape index: {}]  }
   0x1   :  { %v12_v0 = vld [vmem:[%s2476_s1] sm:$0xff]  ;;  %v13_v1 = vld [vmem:[%s2476_s1 + $0x8] sm:$0xff]  ;;  %v14_v2 = vld [vmem:[%s2476_s1 + $0x10] sm:$0xff] }
   0x2   :  { %v1811_v3 = vpack.c.bf16 %v13_v1, %v12_v0  ;;  %v15_v4 = vld [vmem:[%s2476_s1 + $0x18] sm:$0xff]  ;;  %v31_v5 = vld [vmem:[%s2475_s0] sm:$0xff]  ;;  %v32_v8 = vld [vmem:[%s2475_s0 + $0x8] sm:$0xff] }
   0x3   :  { %v1815_v6 = vpack.c.bf16 %v15_v4, %v14_v2  ;;  %1671 = vmatprep.mubr.msk.f32.mxu0 %vm99_vm0, %v31_v5  ;;  %v16_v7 = vld [vmem:[%s2476_s1 + $0x20] sm:$0xf]  ;;  %v33_v9 = vld [vmem:[%s2475_s0 + $0x10] sm:$0xff]  ;;  %v80_v11 = vld [vmem:[%s2475_s0 + $0x188] sm:$0xff] }
   0x4   :  { %1812 = vmatprep.subr.bf16.mxu0 %v1811_v3  ;;  %1901 = vmatprep.subr.bf16.mxu1 %v1811_v3  ;;  %v79_v10 = vld [vmem:[%s2475_s0 + $0x180] sm:$0xff]  ;;  %v81_v12 = vld [vmem:[%s2475_s0 + $0x190] sm:$0xff]  ;;  %v34_v13 = vld [vmem:[%s2475_s0 + $0x18] sm:$0xff] }
   0x5   :  { %1814 = vmatpush3.bf16.msra.mxu0 %v1811_v3  ;;  %1904 = vmatpush3.bf16.msra.mxu1 %v1811_v3  ;;  %v35_v14 = vld [vmem:[%s2475_s0 + $0x20] sm:$0xff]  ;;  %v82_v15 = vld [vmem:[%s2475_s0 + $0x198] sm:$0xff]  ;;  %v36_v17 = vld [vmem:[%s2475_s0 + $0x28] sm:$0xff] }
   0x6   :  { %1816 = vmatprep.subr.bf16.mxu0 %v1815_v6  ;;  %1902 = vmatprep.subr.bf16.mxu1 %v1815_v6  ;;  %v83_v16 = vld [vmem:[%s2475_s0 + $0x1a0] sm:$0xff]  ;;  %v37_v18 = vld [vmem:[%s2475_s0 + $0x30] sm:$0xff]  ;;  %v84_v19 = vld [vmem:[%s2475_s0 + $0x1a8] sm:$0xff] }
   0x7   :  { %1743 = vmatprep.mubr.msk.f32.mxu1 %vm99_vm0, %v79_v10  ;;  %v85_v20 = vld [vmem:[%s2475_s0 + $0x1b0] sm:$0xff]  ;;  %v38_v21 = vld [vmem:[%s2475_s0 + $0x38] sm:$0xff]  ;;  %v39_v22 = vld [vmem:[%s2475_s0 + $0x40] sm:$0xff] }
   0x8   :  { %v86_v23 = vld [vmem:[%s2475_s0 + $0x1b8] sm:$0xff] }
   0x9   :  { %1818 = vmatpush3.bf16.msra.mxu0 %v1815_v6  ;;  %1905 = vmatpush3.bf16.msra.mxu1 %v1815_v6 }
   0xa   :  { %1669 = vmatprep.subr.msk.mxu0 %vm292_vm1, %v16_v7  ;;  %1903 = vmatprep.subr.msk.mxu1 %vm292_vm1, %v16_v7 }
   0xd   :  { %1670 = vmatpush3.msk.msra.mxu0 %vm292_vm1, %v16_v7  ;;  %1906 = vmatpush3.msk.msra.mxu1 %vm292_vm1, %v16_v7 }
   0xe   :  { %1672 = vmatmul.mubr.msk.f32.vlgmr.msra.gmra.mrb[0].mxu0 %vm99_vm0, %v32_v8  ;;  %1744 = vmatmul.mubr.msk.f32.vlgmr.msra.gmra.mrb[0].mxu1 %vm99_vm0, %v80_v11 }
   0xf   :  { %1674 = vmatprep.mubr.msk.f32.mxu0 %vm99_vm0, %v33_v9  ;;  %1746 = vmatprep.mubr.msk.f32.mxu1 %vm99_vm0, %v81_v12 }
  0x12   :  { %1675 = vmatmul.mubr.msk.f32.gmra.mrb[2].mxu0 %vm99_vm0, %v34_v13  ;;  %1747 = vmatmul.mubr.msk.f32.gmra.mrb[2].mxu1 %vm99_vm0, %v82_v15 }
  0x13   :  { %1677 = vmatprep.mubr.msk.f32.mxu0 %vm99_vm0, %v35_v14  ;;  %1749 = vmatprep.mubr.msk.f32.mxu1 %vm99_vm0, %v83_v16 }
  0x16   :  { %1678 = vmatmul.mubr.msk.f32.gmra.mrb[4].mxu0 %vm99_vm0, %v36_v17  ;;  %1750 = vmatmul.mubr.msk.f32.gmra.mrb[4].mxu1 %vm99_vm0, %v84_v19 }
  0x17   :  { %1680 = vmatprep.mubr.msk.f32.mxu0 %vm99_vm0, %v37_v18  ;;  %1752 = vmatprep.mubr.msk.f32.mxu1 %vm99_vm0, %v85_v20 }
  0x18   :  { %7 = vsyncpa [#allocation3], 0  ;;  %v87_v24 = vld [vmem:[%s2475_s0 + $0x1c0] sm:$0xff]  ;;  %v40_v25 = vld [vmem:[%s2475_s0 + $0x48] sm:$0xff]  ;;  %v95_v7 = vlaneseq  ;;  %v1942_v14 = vmov 0.00390625   ;;  %vm1944_vm14 = vmmov 0  }
  0x19   :  { %v41_v26 = vld [vmem:[%s2475_s0 + $0x50] sm:$0xff]  ;;  %v88_v27 = vld [vmem:[%s2475_s0 + $0x1c8] sm:$0xff]  ;;  %v42_v29 = vld [vmem:[%s2475_s0 + $0x58] sm:$0xff]  ;;  %vm915_vm15 = vcmask 64512   ;;  %vm997_vm1 = vcmask 130048  }
  0x1a   :  { %1681 = vmatmul.mubr.msk.f32.gmra.mrb[6].mxu0 %vm99_vm0, %v38_v21  ;;  %1753 = vmatmul.mubr.msk.f32.gmra.mrb[6].mxu1 %vm99_vm0, %v86_v23  ;;  %v89_v28 = vld [vmem:[%s2475_s0 + $0x1d0] sm:$0xff]  ;;  %v43_v30 = vld [vmem:[%s2475_s0 + $0x60] sm:$0xff]  ;;  %v90_v31 = vld [vmem:[%s2475_s0 + $0x1d8] sm:$0xff]  ;;  %v2233_v8 = vshrl.u32 %v95_v7, 7  ;;  %v746_v9 = vand.u32 127, %v95_v7 }
  0x1b   :  { %1683 = vmatprep.mubr.msk.f32.mxu0 %vm99_vm0, %v39_v22  ;;  %1755 = vmatprep.mubr.msk.f32.mxu1 %vm99_vm0, %v87_v24  ;;  %v91_v32 = vld [vmem:[%s2475_s0 + $0x1e0] sm:$0xff]  ;;  %v44_v33 = vld [vmem:[%s2475_s0 + $0x68] sm:$0xff]  ;;  %v45_v34 = vld [vmem:[%s2475_s0 + $0x70] sm:$0xff] }
  0x1c   :  { %v92_v35 = vld [vmem:[%s2475_s0 + $0x1e8] sm:$0xff]  ;;  %v93_v36 = vld [vmem:[%s2475_s0 + $0x1f0] sm:$0xff]  ;;  %v46_v37 = vld [vmem:[%s2475_s0 + $0x78] sm:$0xff]  ;;  %v757_v10 = vadd.s32 1, %v2233_v8  ;;  %v747_v11 = vadd.s32 128, %v746_v9  ;;  %v752_v12 = vmul.u32 256, %v2233_v8 }
  0x1d   :  { %v47_v38 = vld [vmem:[%s2475_s0 + $0x80] sm:$0xff]  ;;  %v94_v39 = vld [vmem:[%s2475_s0 + $0x1f8] sm:$0xff]  ;;  %v48_v40 = vld [vmem:[%s2475_s0 + $0x88] sm:$0xff]  ;;  %v749_v16 = vadd.s32 384, %v746_v9  ;;  %v748_v17 = vadd.s32 256, %v746_v9  ;;  %v97_v20 = vsub.s32 0, %v2233_v8 }
  0x1e   :  { %1684 = vmatmul.mubr.msk.f32.gmra.mrb[8].mxu0 %vm99_vm0, %v40_v25  ;;  %1756 = vmatmul.mubr.msk.f32.gmra.mrb[8].mxu1 %vm99_vm0, %v88_v27  ;;  %v49_v41 = vld [vmem:[%s2475_s0 + $0x90] sm:$0xff]  ;;  %v50_v42 = vld [vmem:[%s2475_s0 + $0x98] sm:$0xff]  ;;  %v51_v43 = vld [vmem:[%s2475_s0 + $0xa0] sm:$0xff]  ;;  %v758_v13 = vmul.u32 256, %v757_v10  ;;  %vm754_vm2 = vcmp.ge.s32.totalorder %v747_v11, %v752_v12  ;;  %vm753_vm5 = vcmp.ge.s32.totalorder %v746_v9, %v752_v12  ;;  %v913_v19 = vsub.s32 1, %v2233_v8 }
  0x1f   :  { %1686 = vmatprep.mubr.msk.f32.mxu0 %vm99_vm0, %v41_v26  ;;  %1758 = vmatprep.mubr.msk.f32.mxu1 %vm99_vm0, %v89_v28  ;;  %v52_v44 = vld [vmem:[%s2475_s0 + $0xa8] sm:$0xff]  ;;  %v53_v45 = vld [vmem:[%s2475_s0 + $0xb0] sm:$0xff]  ;;  %v54_v46 = vld [vmem:[%s2475_s0 + $0xb8] sm:$0xff]  ;;  %vm756_vm8 = vcmp.ge.s32.totalorder %v749_v16, %v752_v12  ;;  %vm755_vm11 = vcmp.ge.s32.totalorder %v748_v17, %v752_v12 }
  0x20   :  { %v55_v47 = vld [vmem:[%s2475_s0 + $0xc0] sm:$0xff]  ;;  %v56_v48 = vld [vmem:[%s2475_s0 + $0xc8] sm:$0xff]  ;;  %v57_v49 = vld [vmem:[%s2475_s0 + $0xd0] sm:$0xff]  ;;  %vm760_vm3 = vcmp.lt.s32.totalorder %v747_v11, %v758_v13  ;;  %vm759_vm6 = vcmp.lt.s32.totalorder %v746_v9, %v758_v13  ;;  %vm762_vm9 = vcmp.lt.s32.totalorder %v749_v16, %v758_v13  ;;  %vm761_vm12 = vcmp.lt.s32.totalorder %v748_v17, %v758_v13 }
  0x21   :  { %v58_v50 = vld [vmem:[%s2475_s0 + $0xd8] sm:$0xff]  ;;  %v59_v51 = vld [vmem:[%s2475_s0 + $0xe0] sm:$0xff]  ;;  %v60_v52 = vld [vmem:[%s2475_s0 + $0xe8] sm:$0xff] }
  0x22   :  { %1687 = vmatmul.mubr.msk.f32.gmra.mrb[10].mxu0 %vm99_vm0, %v42_v29  ;;  %1759 = vmatmul.mubr.msk.f32.gmra.mrb[10].mxu1 %vm99_vm0, %v90_v31  ;;  %v61_v53 = vld [vmem:[%s2475_s0 + $0xf0] sm:$0xff]  ;;  %v62_v54 = vld [vmem:[%s2475_s0 + $0xf8] sm:$0xff]  ;;  %v63_v55 = vld [vmem:[%s2475_s0 + $0x100] sm:$0xff] }
  0x23   :  { %1689 = vmatprep.mubr.msk.f32.mxu0 %vm99_vm0, %v43_v30  ;;  %1761 = vmatprep.mubr.msk.f32.mxu1 %vm99_vm0, %v91_v32  ;;  %v64_v56 = vld [vmem:[%s2475_s0 + $0x108] sm:$0xff]  ;;  %v65_v57 = vld [vmem:[%s2475_s0 + $0x110] sm:$0xff]  ;;  %v66_v58 = vld [vmem:[%s2475_s0 + $0x118] sm:$0xff] }
  0x24   :  { %v67_v59 = vld [vmem:[%s2475_s0 + $0x120] sm:$0xff]  ;;  %v68_v60 = vld [vmem:[%s2475_s0 + $0x128] sm:$0xff]  ;;  %v69_v61 = vld [vmem:[%s2475_s0 + $0x130] sm:$0xff] }
  0x25   :  { %v70_v62 = vld [vmem:[%s2475_s0 + $0x138] sm:$0xff]  ;;  %v71_v63 = vld [vmem:[%s2475_s0 + $0x140] sm:$0xff]  ;;  %v72_v0 = vld [vmem:[%s2475_s0 + $0x148] sm:$0xff] }
  0x26   :  { %1690 = vmatmul.mubr.msk.f32.gmra.mrb[12].mxu0 %vm99_vm0, %v44_v33  ;;  %1762 = vmatmul.mubr.msk.f32.gmra.mrb[12].mxu1 %vm99_vm0, %v92_v35  ;;  %v73_v1 = vld [vmem:[%s2475_s0 + $0x150] sm:$0xff]  ;;  %v74_v2 = vld [vmem:[%s2475_s0 + $0x158] sm:$0xff]  ;;  %v75_v3 = vld [vmem:[%s2475_s0 + $0x160] sm:$0xff] }
  0x27   :  { %1692 = vmatprep.mubr.msk.f32.mxu0 %vm99_vm0, %v45_v34  ;;  %1764 = vmatprep.mubr.msk.f32.mxu1 %vm99_vm0, %v93_v36  ;;  %v76_v4 = vld [vmem:[%s2475_s0 + $0x168] sm:$0xff]  ;;  %v77_v5 = vld [vmem:[%s2475_s0 + $0x170] sm:$0xff]  ;;  %v78_v6 = vld [vmem:[%s2475_s0 + $0x178] sm:$0xff] }
  0x28   :  { %vm764_vm4 = vmand %vm754_vm2, %vm760_vm3  ;;  %v2254_v21 = vld [vmem:[%s2476_s1 + $0x90] sm:$0xff] }
  0x29   :  { %vm2238_vm7 = vmand %vm753_vm5, %vm759_vm6  ;;  %v2257_v22 = vrot.slane %v2254_v21, %v97_v20 }
  0x2a   :  { %1693 = vmatmul.mubr.msk.f32.gmra.mrb[14].mxu0 %vm99_vm0, %v46_v37  ;;  %1765 = vmatmul.mubr.msk.f32.gmra.mrb[14].mxu1 %vm99_vm0, %v94_v39  ;;  %vm2242_vm10 = vmand %vm756_vm8, %vm762_vm9  ;;  %vm1412_vm8 = vcmask 74752  }
  0x2b   :  { %1695 = vmatprep.mubr.msk.f32.mxu0 %vm99_vm0, %v47_v38  ;;  %1493 = vmatprep.mubr.msk.f32.mxu1 %vm764_vm4, %v1942_v14  ;;  %vm2246_vm13 = vmand %vm755_vm11, %vm761_vm12 }
  0x2e   :  { %1696 = vmatmul.mubr.msk.f32.gmra.mrb[16].mxu0 %vm99_vm0, %v48_v40 }
  0x2f   :  { %1698 = vmatprep.mubr.msk.f32.mxu0 %vm99_vm0, %v49_v41 }
  0x32   :  { %1699 = vmatmul.mubr.msk.f32.gmra.mrb[18].mxu0 %vm99_vm0, %v50_v42 }
  0x33   :  { %1701 = vmatprep.mubr.msk.f32.mxu0 %vm99_vm0, %v51_v43 }
  0x36   :  { %1702 = vmatmul.mubr.msk.f32.gmra.mrb[20].mxu0 %vm99_vm0, %v52_v44 }
  0x37   :  { %1704 = vmatprep.mubr.msk.f32.mxu0 %vm99_vm0, %v53_v45 }
  0x3a   :  { %1705 = vmatmul.mubr.msk.f32.gmra.mrb[22].mxu0 %vm99_vm0, %v54_v46 }
  0x3b   :  { %1707 = vmatprep.mubr.msk.f32.mxu0 %vm99_vm0, %v55_v47 }
  0x3e   :  { %1708 = vmatmul.mubr.msk.f32.gmra.mrb[24].mxu0 %vm99_vm0, %v56_v48 }
  0x3f   :  { %1710 = vmatprep.mubr.msk.f32.mxu0 %vm99_vm0, %v57_v49 }
  0x42   :  { %1711 = vmatmul.mubr.msk.f32.gmra.mrb[26].mxu0 %vm99_vm0, %v58_v50 }
  0x43   :  { %1713 = vmatprep.mubr.msk.f32.mxu0 %vm99_vm0, %v59_v51 }
  0x46   :  { %1714 = vmatmul.mubr.msk.f32.gmra.mrb[28].mxu0 %vm99_vm0, %v60_v52 }
  0x47   :  { %1716 = vmatprep.mubr.msk.f32.mxu0 %vm99_vm0, %v61_v53 }
  0x4a   :  { %1717 = vmatmul.mubr.msk.f32.gmra.mrb[30].mxu0 %vm99_vm0, %v62_v54 }
  0x4b   :  { %1719 = vmatprep.mubr.msk.f32.mxu0 %vm99_vm0, %v63_v55 }
  0x4e   :  { %1720 = vmatmul.mubr.msk.f32.gmra.mrb[32].mxu0 %vm99_vm0, %v64_v56 }
  0x4f   :  { %1722 = vmatprep.mubr.msk.f32.mxu0 %vm99_vm0, %v65_v57 }
  0x52   :  { %1723 = vmatmul.mubr.msk.f32.gmra.mrb[34].mxu0 %vm99_vm0, %v66_v58 }
  0x53   :  { %1725 = vmatprep.mubr.msk.f32.mxu0 %vm99_vm0, %v67_v59 }
  0x56   :  { %1726 = vmatmul.mubr.msk.f32.gmra.mrb[36].mxu0 %vm99_vm0, %v68_v60 }
  0x57   :  { %1728 = vmatprep.mubr.msk.f32.mxu0 %vm99_vm0, %v69_v61 }
  0x5a   :  { %1729 = vmatmul.mubr.msk.f32.gmra.mrb[38].mxu0 %vm99_vm0, %v70_v62 }
  0x5b   :  { %1731 = vmatprep.mubr.msk.f32.mxu0 %vm99_vm0, %v71_v63 }
  0x5e   :  { %1732 = vmatmul.mubr.msk.f32.gmra.mrb[40].mxu0 %vm99_vm0, %v72_v0 }
  0x5f   :  { %1734 = vmatprep.mubr.msk.f32.mxu0 %vm99_vm0, %v73_v1 }
  0x62   :  { %1735 = vmatmul.mubr.msk.f32.gmra.mrb[42].mxu0 %vm99_vm0, %v74_v2 }
  0x63   :  { %1737 = vmatprep.mubr.msk.f32.mxu0 %vm99_vm0, %v75_v3 }
  0x66   :  { %1738 = vmatmul.mubr.msk.f32.gmra.mrb[44].mxu0 %vm99_vm0, %v76_v4 }
  0x67   :  { %1740 = vmatprep.mubr.msk.f32.mxu0 %vm99_vm0, %v77_v5 }
  0x6a   :  { %1741 = vmatmul.mubr.msk.f32.gmra.mrb[46].mxu0 %vm99_vm0, %v78_v6  ;;  %vm990_vm0 = vcmask 123904  }
  0xe1   :  { %v1673_v23 = vpop.f32.mrb[0].mxu0  ;;  %v1745_v26 = vpop.f32.mrb[0].mxu1 }
  0xe2   :  { %v368_v24 = vadd.f32 %v1673_v23, %v2257_v22  ;;  %v362_v25 = vpop.f32.mrb[1].mxu0  ;;  %v608_v28 = vadd.f32 %v1745_v26, %v2257_v22  ;;  %v602_v29 = vpop.f32.mrb[1].mxu1 }
  0xe3   :  { %v363_v27 = vadd.f32 %v362_v25, %v2257_v22  ;;  %v603_v31 = vadd.f32 %v602_v29, %v2257_v22 }
  0xe4   :  { %v682_v30 = vmax.f32 %v368_v24, 0.0  ;;  %v730_v34 = vmax.f32 %v608_v28, 0.0 }
  0xe5   :  { %v681_v32 = vmax.f32 %v363_v27, 0.0  ;;  %v1676_v33 = vpop.f32.mrb[2].mxu0  ;;  %v729_v37 = vmax.f32 %v603_v31, 0.0  ;;  %v1748_v38 = vpop.f32.mrb[2].mxu1 }
  0xe6   :  { %v378_v35 = vadd.f32 %v1676_v33, %v2257_v22  ;;  %v372_v36 = vpop.f32.mrb[3].mxu0  ;;  %v618_v41 = vadd.f32 %v1748_v38, %v2257_v22  ;;  %v612_v42 = vpop.f32.mrb[3].mxu1 }
  0xe7   :  { %v2264_v39 = vpack.c.bf16 %v682_v30, %v681_v32  ;;  %v373_v40 = vadd.f32 %v372_v36, %v2257_v22  ;;  %v2268_v44 = vpack.c.bf16 %v730_v34, %v729_v37  ;;  %v613_v45 = vadd.f32 %v612_v42, %v2257_v22 }
  0xe8   :  { %v684_v43 = vmax.f32 %v378_v35, 0.0  ;;  %v732_v48 = vmax.f32 %v618_v41, 0.0 }
  0xe9   :  { %v683_v46 = vmax.f32 %v373_v40, 0.0  ;;  %v1679_v47 = vpop.f32.mrb[4].mxu0  ;;  %v731_v51 = vmax.f32 %v613_v45, 0.0  ;;  %v1751_v52 = vpop.f32.mrb[4].mxu1 }
  0xea   :  { %v388_v49 = vadd.f32 %v1679_v47, %v2257_v22  ;;  %v382_v50 = vpop.f32.mrb[5].mxu0  ;;  %v628_v55 = vadd.f32 %v1751_v52, %v2257_v22  ;;  %v622_v56 = vpop.f32.mrb[5].mxu1 }
  0xeb   :  { %v2272_v53 = vpack.c.bf16 %v684_v43, %v683_v46  ;;  %v383_v54 = vadd.f32 %v382_v50, %v2257_v22  ;;  %v2276_v58 = vpack.c.bf16 %v732_v48, %v731_v51  ;;  %v623_v59 = vadd.f32 %v622_v56, %v2257_v22 }
  0xec   :  { %v686_v57 = vmax.f32 %v388_v49, 0.0  ;;  %v734_v62 = vmax.f32 %v628_v55, 0.0 }
  0xed   :  { %v685_v60 = vmax.f32 %v383_v54, 0.0  ;;  %v1682_v61 = vpop.f32.mrb[6].mxu0  ;;  %v733_v1 = vmax.f32 %v623_v59, 0.0  ;;  %v1754_v2 = vpop.f32.mrb[6].mxu1 }
  0xee   :  { %v398_v63 = vadd.f32 %v1682_v61, %v2257_v22  ;;  %v392_v0 = vpop.f32.mrb[7].mxu0  ;;  %v638_v5 = vadd.f32 %v1754_v2, %v2257_v22  ;;  %v632_v6 = vpop.f32.mrb[7].mxu1 }
  0xef   :  { %v2280_v3 = vpack.c.bf16 %v686_v57, %v685_v60  ;;  %v393_v4 = vadd.f32 %v392_v0, %v2257_v22  ;;  %v2284_v9 = vpack.c.bf16 %v734_v62, %v733_v1  ;;  %v633_v10 = vadd.f32 %v632_v6, %v2257_v22 }
  0xf0   :  { %v688_v7 = vmax.f32 %v398_v63, 0.0  ;;  %v736_v13 = vmax.f32 %v638_v5, 0.0 }
  0xf1   :  { %v687_v11 = vmax.f32 %v393_v4, 0.0  ;;  %v1685_v12 = vpop.f32.mrb[8].mxu0  ;;  %v735_v20 = vmax.f32 %v633_v10, 0.0  ;;  %v1757_v23 = vpop.f32.mrb[8].mxu1 }
  0xf2   :  { %v408_v16 = vadd.f32 %v1685_v12, %v2257_v22  ;;  %v402_v17 = vpop.f32.mrb[9].mxu0  ;;  %v648_v26 = vadd.f32 %v1757_v23, %v2257_v22  ;;  %v642_v27 = vpop.f32.mrb[9].mxu1 }
  0xf3   :  { %v2288_v24 = vpack.c.bf16 %v688_v7, %v687_v11  ;;  %v403_v25 = vadd.f32 %v402_v17, %v2257_v22  ;;  %v2292_v29 = vpack.c.bf16 %v736_v13, %v735_v20  ;;  %v643_v30 = vadd.f32 %v642_v27, %v2257_v22 }
  0xf4   :  { %v690_v28 = vmax.f32 %v408_v16, 0.0  ;;  %v738_v33 = vmax.f32 %v648_v26, 0.0 }
  0xf5   :  { %v689_v31 = vmax.f32 %v403_v25, 0.0  ;;  %v1688_v32 = vpop.f32.mrb[10].mxu0  ;;  %v737_v36 = vmax.f32 %v643_v30, 0.0  ;;  %v1760_v37 = vpop.f32.mrb[10].mxu1 }
  0xf6   :  { %v418_v34 = vadd.f32 %v1688_v32, %v2257_v22  ;;  %v412_v35 = vpop.f32.mrb[11].mxu0  ;;  %v658_v41 = vadd.f32 %v1760_v37, %v2257_v22  ;;  %v652_v42 = vpop.f32.mrb[11].mxu1 }
  0xf7   :  { %v2296_v38 = vpack.c.bf16 %v690_v28, %v689_v31  ;;  %v413_v40 = vadd.f32 %v412_v35, %v2257_v22  ;;  %v2300_v45 = vpack.c.bf16 %v738_v33, %v737_v36  ;;  %v653_v46 = vadd.f32 %v652_v42, %v2257_v22 }
  0xf8   :  { %v692_v43 = vmax.f32 %v418_v34, 0.0  ;;  %v740_v49 = vmax.f32 %v658_v41, 0.0 }
  0xf9   :  { %v691_v47 = vmax.f32 %v413_v40, 0.0  ;;  %v1691_v48 = vpop.f32.mrb[12].mxu0  ;;  %v739_v52 = vmax.f32 %v653_v46, 0.0  ;;  %v1763_v54 = vpop.f32.mrb[12].mxu1 }
  0xfa   :  { %v428_v50 = vadd.f32 %v1691_v48, %v2257_v22  ;;  %v422_v51 = vpop.f32.mrb[13].mxu0  ;;  %v668_v57 = vadd.f32 %v1763_v54, %v2257_v22  ;;  %v662_v59 = vpop.f32.mrb[13].mxu1 }
  0xfb   :  { %v2304_v55 = vpack.c.bf16 %v692_v43, %v691_v47  ;;  %v423_v56 = vadd.f32 %v422_v51, %v2257_v22  ;;  %v2308_v61 = vpack.c.bf16 %v740_v49, %v739_v52  ;;  %v663_v62 = vadd.f32 %v662_v59, %v2257_v22 }
  0xfc   :  { %v694_v60 = vmax.f32 %v428_v50, 0.0  ;;  %v742_v1 = vmax.f32 %v668_v57, 0.0 }
  0xfd   :  { %v693_v63 = vmax.f32 %v423_v56, 0.0  ;;  %v1694_v0 = vpop.f32.mrb[14].mxu0  ;;  %v741_v5 = vmax.f32 %v663_v62, 0.0  ;;  %v1766_v6 = vpop.f32.mrb[14].mxu1 }
  0xfe   :  { %v438_v2 = vadd.f32 %v1694_v0, %v2257_v22  ;;  %v432_v4 = vpop.f32.mrb[15].mxu0  ;;  %v678_v11 = vadd.f32 %v1766_v6, %v2257_v22  ;;  %v672_v12 = vpop.f32.mrb[15].mxu1 }
  0xff   :  { %v2312_v7 = vpack.c.bf16 %v694_v60, %v693_v63  ;;  %v433_v10 = vadd.f32 %v432_v4, %v2257_v22  ;;  %v2316_v16 = vpack.c.bf16 %v742_v1, %v741_v5  ;;  %v673_v17 = vadd.f32 %v672_v12, %v2257_v22 }
 0x100   :  { %v696_v13 = vmax.f32 %v438_v2, 0.0  ;;  %v744_v25 = vmax.f32 %v678_v11, 0.0 }
 0x101   :  { %v695_v20 = vmax.f32 %v433_v10, 0.0  ;;  %v1697_v23 = vpop.f32.mrb[16].mxu0  ;;  %v743_v28 = vmax.f32 %v673_v17, 0.0 }
 0x102   :  { %v448_v26 = vadd.f32 %v1697_v23, %v2257_v22  ;;  %v442_v27 = vpop.f32.mrb[17].mxu0 }
 0x103   :  { %v2320_v30 = vpack.c.bf16 %v696_v13, %v695_v20  ;;  %v443_v31 = vadd.f32 %v442_v27, %v2257_v22  ;;  %v2323_v33 = vpack.c.bf16 %v744_v25, %v743_v28 }
 0x104   :  { %v698_v32 = vmax.f32 %v448_v26, 0.0 }
 0x105   :  { %v697_v34 = vmax.f32 %v443_v31, 0.0  ;;  %v1700_v35 = vpop.f32.mrb[18].mxu0 }
 0x106   :  { %v458_v36 = vadd.f32 %v1700_v35, %v2257_v22  ;;  %v452_v37 = vpop.f32.mrb[19].mxu0 }
 0x107   :  { %v1819_v40 = vpack.c.bf16 %v698_v32, %v697_v34  ;;  %v453_v41 = vadd.f32 %v452_v37, %v2257_v22 }
 0x108   :  { %v700_v42 = vmax.f32 %v458_v36, 0.0 }
 0x109   :  { %v699_v43 = vmax.f32 %v453_v41, 0.0  ;;  %v1703_v46 = vpop.f32.mrb[20].mxu0  ;;  %1820 = vmatprep.subr.bf16.mxu1 %v1819_v40 }
 0x10a   :  { %v468_v47 = vadd.f32 %v1703_v46, %v2257_v22  ;;  %v462_v48 = vpop.f32.mrb[21].mxu0  ;;  %1822 = vmatpush3.bf16.msra.mxu1 %v2264_v39 }
 0x10b   :  { %v1823_v49 = vpack.c.bf16 %v700_v42, %v699_v43  ;;  %v463_v50 = vadd.f32 %v462_v48, %v2257_v22 }
 0x10c   :  { %v702_v51 = vmax.f32 %v468_v47, 0.0 }
 0x10d   :  { %v701_v52 = vmax.f32 %v463_v50, 0.0  ;;  %v1706_v54 = vpop.f32.mrb[22].mxu0  ;;  %1824 = vmatprep.subr.bf16.mxu1 %v1823_v49 }
 0x10e   :  { %v478_v56 = vadd.f32 %v1706_v54, %v2257_v22  ;;  %v472_v57 = vpop.f32.mrb[23].mxu0  ;;  %1826 = vmatpush3.bf16.msra.mxu1 %v2272_v53 }
 0x10f   :  { %v1827_v59 = vpack.c.bf16 %v702_v51, %v701_v52  ;;  %v473_v60 = vadd.f32 %v472_v57, %v2257_v22 }
 0x110   :  { %v704_v62 = vmax.f32 %v478_v56, 0.0 }
 0x111   :  { %v703_v63 = vmax.f32 %v473_v60, 0.0  ;;  %v1709_v0 = vpop.f32.mrb[24].mxu0  ;;  %1828 = vmatprep.subr.bf16.mxu1 %v1827_v59 }
 0x112   :  { %v488_v39 = vadd.f32 %v1709_v0, %v2257_v22  ;;  %v482_v1 = vpop.f32.mrb[25].mxu0  ;;  %1830 = vmatpush3.bf16.msra.mxu1 %v2280_v3 }
 0x113   :  { %v1831_v2 = vpack.c.bf16 %v704_v62, %v703_v63  ;;  %v483_v4 = vadd.f32 %v482_v1, %v2257_v22 }
 0x114   :  { %v706_v5 = vmax.f32 %v488_v39, 0.0 }
 0x115   :  { %v705_v6 = vmax.f32 %v483_v4, 0.0  ;;  %v1712_v10 = vpop.f32.mrb[26].mxu0  ;;  %1832 = vmatprep.subr.bf16.mxu1 %v1831_v2 }
 0x116   :  { %v498_v53 = vadd.f32 %v1712_v10, %v2257_v22  ;;  %v492_v11 = vpop.f32.mrb[27].mxu0  ;;  %1834 = vmatpush3.bf16.msra.mxu1 %v2288_v24 }
 0x117   :  { %v1835_v12 = vpack.c.bf16 %v706_v5, %v705_v6  ;;  %v493_v13 = vadd.f32 %v492_v11, %v2257_v22 }
 0x118   :  { %v708_v17 = vmax.f32 %v498_v53, 0.0 }
 0x119   :  { %v707_v20 = vmax.f32 %v493_v13, 0.0  ;;  %v1715_v23 = vpop.f32.mrb[28].mxu0  ;;  %1836 = vmatprep.subr.bf16.mxu1 %v1835_v12 }
 0x11a   :  { %v508_v3 = vadd.f32 %v1715_v23, %v2257_v22  ;;  %v502_v25 = vpop.f32.mrb[29].mxu0  ;;  %1838 = vmatpush3.bf16.msra.mxu1 %v2296_v38 }
 0x11b   :  { %v1839_v26 = vpack.c.bf16 %v708_v17, %v707_v20  ;;  %v503_v27 = vadd.f32 %v502_v25, %v2257_v22 }
 0x11c   :  { %v710_v28 = vmax.f32 %v508_v3, 0.0 }
 0x11d   :  { %v709_v31 = vmax.f32 %v503_v27, 0.0  ;;  %v1718_v32 = vpop.f32.mrb[30].mxu0  ;;  %1840 = vmatprep.subr.bf16.mxu1 %v1839_v26 }
 0x11e   :  { %v518_v24 = vadd.f32 %v1718_v32, %v2257_v22  ;;  %v512_v34 = vpop.f32.mrb[31].mxu0  ;;  %1842 = vmatpush3.bf16.msra.mxu1 %v2304_v55 }
 0x11f   :  { %v1843_v35 = vpack.c.bf16 %v710_v28, %v709_v31  ;;  %v513_v36 = vadd.f32 %v512_v34, %v2257_v22 }
 0x120   :  { %v712_v37 = vmax.f32 %v518_v24, 0.0 }
 0x121   :  { %v711_v40 = vmax.f32 %v513_v36, 0.0  ;;  %v1721_v41 = vpop.f32.mrb[32].mxu0  ;;  %1844 = vmatprep.subr.bf16.mxu1 %v1843_v35 }
 0x122   :  { %v528_v38 = vadd.f32 %v1721_v41, %v2257_v22  ;;  %v522_v42 = vpop.f32.mrb[33].mxu0  ;;  %1846 = vmatpush3.bf16.msra.mxu1 %v2312_v7 }
 0x123   :  { %v1847_v43 = vpack.c.bf16 %v712_v37, %v711_v40  ;;  %v523_v46 = vadd.f32 %v522_v42, %v2257_v22 }
 0x124   :  { %v714_v47 = vmax.f32 %v528_v38, 0.0 }
 0x125   :  { %v713_v48 = vmax.f32 %v523_v46, 0.0  ;;  %v1724_v49 = vpop.f32.mrb[34].mxu0  ;;  %1848 = vmatprep.subr.bf16.mxu1 %v1847_v43 }
 0x126   :  { %v538_v55 = vadd.f32 %v1724_v49, %v2257_v22  ;;  %v532_v50 = vpop.f32.mrb[35].mxu0  ;;  %1850 = vmatpush3.bf16.msra.mxu1 %v2320_v30 }
 0x127   :  { %v1853_v51 = vpack.c.bf16 %v714_v47, %v713_v48  ;;  %v533_v52 = vadd.f32 %v532_v50, %v2257_v22  ;;  %1852 = vmatprep.subr.bf16.mxu1 %v2268_v44  ;;  %v914_v47 = vrot.slane %v2254_v21, %v913_v19 }
 0x128   :  { %v716_v54 = vmax.f32 %v538_v55, 0.0 }
 0x129   :  { %v715_v56 = vmax.f32 %v533_v52, 0.0  ;;  %v1727_v7 = vpop.f32.mrb[36].mxu0  ;;  %1494 = vmatmul.mubr.msk.f32.vlgmr.msra.gmra.mrb[16].mxu1 %vm2238_vm7, %v1942_v14  ;;  %v18_v52 = vld [vmem:[%s2476_s1 + $0x30] sm:$0xff]  ;;  %vm1338_vm7 = vcmask 261120  }
 0x12a   :  { %v548_v57 = vadd.f32 %v1727_v7, %v2257_v22  ;;  %v542_v59 = vpop.f32.mrb[37].mxu0  ;;  %1854 = vmatpush3.bf16.msra.mxu1 %v1853_v51  ;;  %1495 = vmatprep.mubr.msk.f32.mxu1 %vm2242_vm10, %v1942_v14 }
 0x12b   :  { %v1857_v30 = vpack.c.bf16 %v716_v54, %v715_v56  ;;  %v543_v60 = vadd.f32 %v542_v59, %v2257_v22  ;;  %1856 = vmatprep.subr.bf16.mxu1 %v2276_v58  ;;  %v19_v54 = vld [vmem:[%s2476_s1 + $0x38] sm:$0xff]  ;;  %v1945_v56 = vmov 0.0|0.0  }
 0x12c   :  { %v718_v44 = vmax.f32 %v548_v57, 0.0  ;;  %v1884_v7 = vpack.c.bf16 %v19_v54, %v18_v52 }
 0x12d   :  { %v717_v62 = vmax.f32 %v543_v60, 0.0  ;;  %v1730_v63 = vpop.f32.mrb[38].mxu0 }
 0x12e   :  { %v558_v0 = vadd.f32 %v1730_v63, %v2257_v22  ;;  %v552_v15 = vpop.f32.mrb[39].mxu0  ;;  %1858 = vmatpush3.bf16.msra.mxu1 %v1857_v30 }
 0x12f   :  { %v1861_v39 = vpack.c.bf16 %v718_v44, %v717_v62  ;;  %v553_v1 = vadd.f32 %v552_v15, %v2257_v22  ;;  %1860 = vmatprep.subr.bf16.mxu1 %v2284_v9  ;;  %v1073_v44 = vsub.s32 2, %v2233_v8 }
 0x130   :  { %v720_v2 = vmax.f32 %v558_v0, 0.0 }
 0x131   :  { %v719_v18 = vmax.f32 %v553_v1, 0.0  ;;  %v1733_v4 = vpop.f32.mrb[40].mxu0  ;;  %v1074_v62 = vrot.slane %v2254_v21, %v1073_v44 }
 0x132   :  { %v568_v5 = vadd.f32 %v1733_v4, %v2257_v22  ;;  %v562_v6 = vpop.f32.mrb[41].mxu0  ;;  %1862 = vmatpush3.bf16.msra.mxu1 %v1861_v39 }
 0x133   :  { %v1865_v58 = vpack.c.bf16 %v720_v2, %v719_v18  ;;  %v563_v10 = vadd.f32 %v562_v6, %v2257_v22  ;;  %1864 = vmatprep.subr.bf16.mxu1 %v2292_v29 }
 0x134   :  { %v722_v53 = vmax.f32 %v568_v5, 0.0 }
 0x135   :  { %v721_v11 = vmax.f32 %v563_v10, 0.0  ;;  %v1736_v12 = vpop.f32.mrb[42].mxu0 }
 0x136   :  { %v578_v13 = vadd.f32 %v1736_v12, %v2257_v22  ;;  %v572_v17 = vpop.f32.mrb[43].mxu0  ;;  %1866 = vmatpush3.bf16.msra.mxu1 %v1865_v58 }
 0x137   :  { %v1869_v9 = vpack.c.bf16 %v722_v53, %v721_v11  ;;  %v573_v20 = vadd.f32 %v572_v17, %v2257_v22  ;;  %1868 = vmatprep.subr.bf16.mxu1 %v2300_v45 }
 0x138   :  { %v724_v23 = vmax.f32 %v578_v13, 0.0 }
 0x139   :  { %v723_v3 = vmax.f32 %v573_v20, 0.0  ;;  %v1739_v25 = vpop.f32.mrb[44].mxu0 }
 0x13a   :  { %v588_v26 = vadd.f32 %v1739_v25, %v2257_v22  ;;  %v582_v27 = vpop.f32.mrb[45].mxu0  ;;  %1870 = vmatpush3.bf16.msra.mxu1 %v1869_v9 }
 0x13b   :  { %v1873_v29 = vpack.c.bf16 %v724_v23, %v723_v3  ;;  %v583_v28 = vadd.f32 %v582_v27, %v2257_v22  ;;  %1872 = vmatprep.subr.bf16.mxu1 %v2308_v61  ;;  %v1943_v61 = vmov 0.0   ;;  %v21_v27 = vld [vmem:[%s2476_s1 + $0x48] sm:$0xff] }
 0x13c   :  { %v726_v31 = vmax.f32 %v588_v26, 0.0  ;;  %v20_v26 = vld [vmem:[%s2476_s1 + $0x40] sm:$0xff] }
 0x13d   :  { %v725_v32 = vmax.f32 %v583_v28, 0.0  ;;  %v1742_v24 = vpop.f32.mrb[46].mxu0 }
 0x13e   :  { %v598_v34 = vadd.f32 %v1742_v24, %v2257_v22  ;;  %v592_v35 = vpop.f32.mrb[47].mxu0  ;;  %1874 = vmatpush3.bf16.msra.mxu1 %v1873_v29  ;;  %v1887_v29 = vpack.c.bf16 %v21_v27, %v20_v26 }
 0x13f   :  { %v1877_v45 = vpack.c.bf16 %v726_v31, %v725_v32  ;;  %v593_v36 = vadd.f32 %v592_v35, %v2257_v22  ;;  %1876 = vmatprep.subr.bf16.mxu1 %v2316_v16  ;;  %v17_v22 = vld [vmem:[%s2476_s1 + $0x28] sm:$0xff]  ;;  %v24_v31 = vld [vmem:[%s2476_s1 + $0x60] sm:$0xff] }
 0x140   :  { %v728_v37 = vmax.f32 %v598_v34, 0.0  ;;  %v25_v32 = vld [vmem:[%s2476_s1 + $0x68] sm:$0xff] }
 0x141   :  { %v727_v40 = vmax.f32 %v593_v36, 0.0  ;;  %v1890_v34 = vpack.c.bf16 %v25_v32, %v24_v31  ;;  %v23_v36 = vld [vmem:[%s2476_s1 + $0x58] sm:$0xff] }
 0x142   :  { %1878 = vmatpush3.bf16.msra.mxu1 %v1877_v45  ;;  %v22_v45 = vld [vmem:[%s2476_s1 + $0x50] sm:$0xff] }
 0x143   :  { %v1881_v41 = vpack.c.bf16 %v728_v37, %v727_v40  ;;  %1880 = vmatprep.subr.bf16.mxu1 %v2323_v33  ;;  %v1893_v37 = vpack.c.bf16 %v23_v36, %v22_v45 }
 0x146   :  { %1882 = vmatpush3.bf16.msra.mxu1 %v1881_v41 }
 0x147   :  { %1767 = vmatprep.subr.mxu1 %v1943_v61 }
 0x149   :  { %1496 = vmatmul.mubr.msk.f32.vlgmr.msra.gmra.mrb[18].mxu1 %vm2246_vm13, %v1942_v14 }
 0x14a   :  { %1768 = vmatpush3.msra.mxu1 %v17_v22  ;;  %1769 = vmatprep.mubr.msk.f32.mxu1 %vm1944_vm14, %v1943_v61  ;;  %v26_v22 = vld [vmem:[%s2476_s1 + $0x70] sm:$0xff] }
 0x14b   :  { %1883 = vmatprep.subr.bf16.mxu1 %v1945_v56 }
 0x1fc   :  { %v1604_v16 = vpop.f32.mrb[16].mxu1 }
 0x1fd   :  { %v1605_v38 = vpop.f32.mrb[17].mxu1 }
 0x1fe   :  { %v1606_v33 = vadd.f32 %v1605_v38, %v1604_v16  ;;  %v27_v16 = vld [vmem:[%s2476_s1 + $0x78] sm:$0xff] }
 0x1ff   :  { %v1896_v38 = vpack.c.bf16 %v27_v16, %v26_v22 }
 0x21c   :  { %v1639_v42 = vpop.f32.mrb[18].mxu1 }
 0x21d   :  { %v1640_v43 = vpop.f32.mrb[19].mxu1 }
 0x21e   :  { %v1641_v46 = vadd.f32 %v1640_v43, %v1639_v42  ;;  %v1330_v43 = vsub.s32 3, %v2233_v8 }
 0x220   :  { %v908_v14 = vadd.f32 %v1641_v46, %v1606_v33  ;;  %v28_v33 = vld [vmem:[%s2476_s1 + $0x80] sm:$0xff]  ;;  %v1331_v19 = vrot.slane %v2254_v21, %v1330_v43 }
 0x222   :  { %1770 = vmatmul.mubr.msk.f32.vlgmr.msra.gmra.mrb[20].mxu1 %vm915_vm15, %v908_v14 }
 0x223   :  { %1776 = vmatprep.mubr.msk.f32.mxu1 %vm1944_vm14, %v1943_v61  ;;  %1885 = vmatpush3.bf16.msra.mxu1 %v1884_v7 }
 0x224   :  { %1886 = vmatprep.subr.bf16.mxu1 %v1945_v56 }
 0x2f5   :  { %v985_v48 = vpop.f32.mrb[20].mxu1 }
 0x2f6   :  { %v2390_v49 = vadd.f32 %v985_v48, %v914_v47  ;;  %v1771_v55 = vpop.f32.mrb[21].mxu1 }
 0x2f8   :  { %v989_v50 = vmul.f32 %v2390_v49, %v2390_v49 }
 0x2fa   :  { %v991_v51 = vsel %vm990_vm0, %v989_v50, 0.0 }
 0x2fb   :  { %992 = vadd.xlane.f32.xlu0 %v991_v51  ;;  %v1336_v51 = vsub.s32 4, %v2233_v8 }
 0x2fd   :  { %v1337_v52 = vrot.slane %v2254_v21, %v1336_v51 }
 0x388   :  { %v993_v57 = vpop.xlane.xlu0 %992 }
 0x389   :  { %v994_v59 = vadd.f32 1e-08, %v993_v57 }
 0x38b   :  { %1912 = vrsqrt.f32 %v994_v59 }
 0x395   :  { %v1913_v30 = vpop.eup %1912 }
 0x396   :  { %v996_v60 = vmul.f32 %v1913_v30, %v2390_v49 }
 0x398   :  { %1777 = vmatmul.mubr.msk.f32.vlgmr.msra.gmra.mrb[22].mxu1 %vm997_vm1, %v996_v60 }
 0x399   :  { %1783 = vmatprep.mubr.msk.f32.mxu1 %vm1944_vm14, %v1943_v61  ;;  %1888 = vmatpush3.bf16.msra.mxu1 %v1887_v29 }
 0x39a   :  { %1889 = vmatprep.subr.bf16.mxu1 %v1945_v56 }
 0x46b   :  { %v1067_v63 = vpop.f32.mrb[22].mxu1 }
 0x46c   :  { %v1075_v0 = vmul.f32 %v1074_v62, %v1067_v63  ;;  %v1778_v15 = vpop.f32.mrb[23].mxu1 }
 0x46e   :  { %v1076_v39 = vsel %vm990_vm0, %v1075_v0, -inf }
 0x46f   :  { %1077 = vmax.xlane.f32.xlu0 %v1076_v39 }
 0x4fc   :  { %v1078_v1 = vpop.xlane.xlu0 %1077 }
 0x4fd   :  { %vm1079_vm2 = vcmp.eq.f32.partialorder %v1075_v0, %v1078_v1 }
 0x4fe   :  { %v1080_v2 = vsel %vm1079_vm2, -1e+30, %v1075_v0 }
 0x4ff   :  { %v1081_v18 = vsel %vm990_vm0, %v1080_v2, -inf }
 0x500   :  { %1082 = vmax.xlane.f32.xlu1 %v1081_v18 }
 0x58d   :  { %v1083_v4 = vpop.xlane.xlu1 %1082 }
 0x58e   :  { %vm1084_vm3 = vcmp.eq.f32.partialorder %v1080_v2, %v1083_v4 }
 0x58f   :  { %v1085_v5 = vsel %vm1084_vm3, -1e+30, %v1080_v2 }
 0x590   :  { %v1086_v6 = vsel %vm990_vm0, %v1085_v5, -inf }
 0x591   :  { %1087 = vmax.xlane.f32.xlu1 %v1086_v6 }
 0x61e   :  { %v1088_v58 = vpop.xlane.xlu1 %1087 }
 0x61f   :  { %vm1089_vm4 = vcmp.eq.f32.partialorder %v1085_v5, %v1088_v58 }
 0x620   :  { %v1090_v10 = vsel %vm1089_vm4, -1e+30, %v1085_v5 }
 0x621   :  { %v1091_v53 = vsel %vm990_vm0, %v1090_v10, -inf }
 0x622   :  { %1092 = vmax.xlane.f32.xlu0 %v1091_v53 }
 0x6af   :  { %v1093_v11 = vpop.xlane.xlu0 %1092 }
 0x6b0   :  { %vm1094_vm5 = vcmp.eq.f32.partialorder %v1090_v10, %v1093_v11 }
 0x6b1   :  { %v1095_v12 = vsel %vm1094_vm5, -1e+30, %v1090_v10 }
 0x6b2   :  { %vm1096_vm6 = vcmp.lt.f32.partialorder %v1095_v12, -1e+29 }
 0x6b3   :  { %v1097_v13 = vsel %vm1096_vm6, %v1075_v0, -1e+30 }
 0x6b4   :  { %v1098_v17 = vsel %vm990_vm0, %v1097_v13, -inf }
 0x6b5   :  { %1099 = vmax.xlane.f32.xlu1 %v1098_v17 }
 0x742   :  { %v1100_v9 = vpop.xlane.xlu1 %1099 }
 0x743   :  { %v1101_v20 = vsub.f32 %v1097_v13, %v1100_v9 }
 0x745   :  { %v1102_v23 = vmul.f32 1.442695, %v1101_v20 }
 0x747   :  { %1914 = vpow2.f32 %v1102_v23 }
 0x751   :  { %v1915_v3 = vpop.eup %1914 }
 0x752   :  { %v1104_v25 = vsel %vm990_vm0, %v1915_v3, 0.0 }
 0x753   :  { %1105 = vadd.xlane.f32.xlu0 %v1104_v25 }
 0x7e0   :  { %v1106_v28 = vpop.xlane.xlu0 %1105 }
 0x7e1   :  { %1916 = vrcp.f32 %v1106_v28 }
 0x7eb   :  { %v1917_v24 = vpop.eup %1916 }
 0x7ec   :  { %v1108_v35 = vmul.f32 %v1917_v24, %v1915_v3 }
 0x7ee   :  { %1784 = vmatmul.mubr.msk.f32.vlgmr.msra.gmra.mrb[24].mxu1 %vm997_vm1, %v1108_v35 }
 0x7ef   :  { %1891 = vmatpush3.bf16.msra.mxu1 %v1890_v34  ;;  %1790 = vmatprep.mubr.msk.f32.mxu1 %vm1944_vm14, %v1943_v61 }
 0x7f0   :  { %1892 = vmatprep.subr.bf16.mxu1 %v1945_v56 }
 0x8c1   :  { %v1178_v40 = vpop.f32.mrb[24].mxu1 }
 0x8c2   :  { %v1785_v41 = vpop.f32.mrb[25].mxu1  ;;  %1791 = vmatmul.mubr.msk.f32.vlgmr.msra.gmra.mrb[26].mxu1 %vm997_vm1, %v1178_v40 }
 0x8c3   :  { %1894 = vmatpush3.bf16.msra.mxu1 %v1893_v37  ;;  %1797 = vmatprep.mubr.msk.f32.mxu1 %vm1944_vm14, %v1943_v61 }
 0x8c4   :  { %1895 = vmatprep.subr.bf16.mxu1 %v1945_v56 }
 0x8c6   :  { %1798 = vmatmul.mubr.msk.f32.vlgmr.msra.gmra.mrb[28].mxu1 %vm997_vm1, %v2390_v49 }
 0x8c7   :  { %1808 = vmatprep.mubr.msk.f32.mxu1 %vm1944_vm14, %v1943_v61  ;;  %1897 = vmatpush3.bf16.msra.mxu1 %v1896_v38  ;;  %v29_v61 = vld [vmem:[%s2476_s1 + $0x88] sm:$0xff]  ;;  %s1946_s1 = smov [#allocation2]  }
 0x8c8   :  { %1898 = vmatprep.subr.bf16.mxu1 %v1945_v56  ;;  %v1899_v42 = vpack.c.bf16 %v29_v61, %v28_v33  ;;  %s1420_s6 = sshll.u32 %s1946_s1, 4  ;;  %s1421_s6 = int_to_ptr.vmem [resolvable:$true] %s1420_s6 }
 0x8c9   :  { %s1918_s0 = scalar_lea.vmem %s1421_s6, 32  ;;  %p1923_p1 = scmp.lt.s32.totalorder %s1421_s6, %s1421_s6 }
 0x8ca   :  { %p1919_p0 = scmp.ne.s32.totalorder %s1421_s6, %s1918_s0  ;;  %p1924_p2 = scmp.lt.s32.totalorder %s1918_s0, %s1918_s0 }
 0x8cb   :  { %1900 = vmatpush3.bf16.msra.mxu1 %v1899_v42 }
 0x8cc   :  { %p1925_p3 = por %p1924_p2, %p1923_p1 }
 0x8ce   :  { %p1926_p4 = pnand %p1925_p3, %p1919_p0 }
 0x995   :  { %v1251_v46 = vpop.f32.mrb[26].mxu1 }
 0x996   :  { %v1792_v14 = vpop.f32.mrb[27].mxu1 }
 0x999   :  { %v1324_v47 = vpop.f32.mrb[28].mxu1 }
 0x99a   :  { %v1325_v48 = vadd.f32 %v1324_v47, %v1251_v46  ;;  %v1799_v49 = vpop.f32.mrb[29].mxu1 }
 0x99c   :  { %v1332_v55 = vadd.f32 %v1331_v19, %v1325_v48 }
 0x99e   :  { %v1333_v50 = vmax.f32 %v1332_v55, 0.0 }
 0x9a0   :  { %1809 = vmatmul.mubr.msk.f32.vlgmr.msra.gmra.mrb[30].mxu1 %vm1338_vm7, %v1333_v50 }
 0xa73   :  { %v1408_v54 = vpop.f32.mrb[30].mxu1 }
 0xa74   :  { %v1409_v56 = vadd.f32 %v1408_v54, %v1337_v52  ;;  %v1810_v7 = vpop.f32.mrb[31].mxu1 }
 0xa76   :  { %1413 = vst.msk [vmem:[#allocation2] sm:$0x3] %vm1412_vm8, %v1409_v56 }
 0xa77   :  { %1929 = shalt.err (!%p1926_p4)
}
 0xa78   :  { %s1930_s9 = scalar_lea.hbm %s2477_s2, 32 }
 0xa79   :  { %p1931_p5 = scmp.ne.s32.totalorder %s2477_s2, %s1930_s9  ;;  %p1934_p6 = scmp.lt.u32.totalorder %s1930_s9, %s2477_s2 }
 0xa7b   :  { %p1936_p7 = pnand %p1934_p6, %p1931_p5 }
 0xa7d   :  { %1939 = shalt.err (!%p1936_p7)
}
 0xa7e   :  { %1423 = dma.vmem_to_hbm [thread:$0]  %s1421_s6, 32, %s2477_s2, [#allocation3]  }
 0xa7f   :  { %1940 = dma.done.wait [#allocation3], 32  }
 0xa80   :  { %1941 = vsyncadd [#allocation3], 4294967264 }
 0xa81   :  { %1427 = vsyncpa [#allocation3], 1 }

</bundles_post_ra>
